<compile_context>
chip_gen: v7x
topology: tpu7x:2x2x1
jax: 0.10.0
libtpu: 0.0.40
codegen_flags: <defaults>
</compile_context>

<pallas_src>
import jax
import jax.numpy as jnp
from jax import lax
from jax.experimental import pallas as pl
from jax.experimental.pallas import tpu as pltpu


# ---------------------------------------------------------------------------
# Small helpers
# ---------------------------------------------------------------------------

def _round_up(x, m):
    return (x + m - 1) // m * m


def _sublane_multiple(dtype):
    # Minimal second-to-last tile dim for a dtype: 8 (f32) / 16 (bf16) / 32 (int8/fp8).
    return max(8, 32 // jnp.dtype(dtype).itemsize)


def _vmem_capacity_bytes():
    """Per-core VMEM capacity (generation-aware), conservative fallback."""
    try:
        info = pltpu.get_tpu_info()
        cap = int(getattr(info, "vmem_capacity_bytes", 0))
        if cap > 0:
            return cap
    except Exception:
        pass
    return 64 * 1024 * 1024   # v7x per-TC size; safe lower bound for v5e/v6e


# Fractions of per-core VMEM used (headroom so the double-buffered fallback for
# the resident weight still fits: 2*0.25 + 0.35 = 0.85 < 0.9 scoped limit).
_RESIDENT_W_FRAC = 0.25
_RESIDENT_TILE_FRAC = 0.35
_VMEM_LIMIT_FRAC = 0.9
_RESIDENT_TILE_M_CAP = 1024

# K/N-tiled path tile targets (sweep-friendly defaults per perf review).
_KT_TM, _KT_TN, _KT_TK = 512, 512, 1024


# ---------------------------------------------------------------------------
# Kernels
# ---------------------------------------------------------------------------

def _linear_resident_kernel(x_ref, w_ref, b_ref, o_ref):
    """One M-tile of y = x @ W^T + b with the full weight resident in VMEM.

    x_ref: [TILE_M, H_in]   (pipelined over the M grid axis)
    w_ref: [H_out, H_in]    (resident: constant block index, single-buffered)
    b_ref: [1, H_out]       (resident)
    o_ref: [TILE_M, H_out]  (pipelined; written in the final output dtype)
    """
    acc = lax.dot_general(
        x_ref[...], w_ref[...],
        dimension_numbers=(((1,), (1,)), ((), ())),   # contract in_features (NT)
        preferred_element_type=jnp.float32)
    o_ref[...] = (acc + b_ref[...].astype(jnp.float32)).astype(o_ref.dtype)


def _linear_ktiled_kernel(x_ref, w_ref, b_ref, o_ref, acc_ref):
    """K/N-tiled path for hidden sizes whose weight does not fit VMEM.

    Grid: (m, n, k) with k the reduction ("arbitrary") axis.
    x_ref: [TILE_M, TK], w_ref: [TN, TK], b_ref: [1, TN]
    o_ref: [TILE_M, TN], acc_ref: VMEM f32 [TILE_M, TN]
    """
    k = pl.program_id(2)

    @pl.when(k == 0)
    def _():
        acc_ref[...] = jnp.zeros_like(acc_ref)

    acc_ref[...] += lax.dot_general(
        x_ref[...], w_ref[...],
        dimension_numbers=(((1,), (1,)), ((), ())),
        preferred_element_type=jnp.float32)

    @pl.when(k == pl.num_programs(2) - 1)
    def _():
        o_ref[...] = (acc_ref[...] + b_ref[...].astype(jnp.float32)).astype(o_ref.dtype)


# ---------------------------------------------------------------------------
# Wrappers
# ---------------------------------------------------------------------------

def _resident_spec(block_shape, single_buffer):
    """BlockSpec with constant index_map; single-buffered when supported."""
    index_map = lambda i: (0,) * len(block_shape)
    if single_buffer:
        try:
            return pl.BlockSpec(block_shape, index_map,
                                pipeline_mode=pl.Buffered(1))
        except TypeError:
            pass
    return pl.BlockSpec(block_shape, index_map)


def _linear_resident(x2d, weight, bias, out_dtype, cost, vmem_cap):
    m, h_in = x2d.shape
    h_out = weight.shape[0]
    sub = _sublane_multiple(x2d.dtype)

    # Size the M tile from the VMEM budget left after the resident weight
    # (x-in and y-out tiles are double-buffered by the pipeline).
    bytes_per_row = 2 * (h_in * x2d.dtype.itemsize
                         + h_out * jnp.dtype(out_dtype).itemsize)
    tile_m = int(_RESIDENT_TILE_FRAC * vmem_cap) // max(bytes_per_row, 1)
    tile_m = max(sub, (tile_m // sub) * sub)
    tile_m = min(tile_m, _RESIDENT_TILE_M_CAP, _round_up(m, sub))

    m_pad = _round_up(m, tile_m)
    if m_pad != m:
        x2d = jnp.pad(x2d, ((0, m_pad - m), (0, 0)))
    b2d = bias.reshape(1, h_out)

    vmem_limit = int(_VMEM_LIMIT_FRAC * vmem_cap)

    def build(single_buffer_w):
        return pl.pallas_call(
            _linear_resident_kernel,
            out_shape=jax.ShapeDtypeStruct((m_pad, h_out), out_dtype),
            grid_spec=pltpu.PrefetchScalarGridSpec(
                num_scalar_prefetch=0,
                grid=(m_pad // tile_m,),
                in_specs=[
                    pl.BlockSpec((tile_m, h_in), lambda i: (i, 0)),     # x: pipelined
                    _resident_spec((h_out, h_in), single_buffer_w),     # W: resident
                    _resident_spec((1, h_out), single_buffer_w),        # b: resident
                ],
                out_specs=pl.BlockSpec((tile_m, h_out), lambda i: (i, 0)),
            ),
            compiler_params=pltpu.CompilerParams(
                dimension_semantics=("parallel",),       # shards M across TCs (v7x)
                vmem_limit_bytes=vmem_limit),
            cost_estimate=cost,
        )

    try:
        out = build(True)(x2d, weight, b2d)
    except Exception:
        # pipeline_mode=pl.Buffered(1) not supported on this jax/libtpu:
        # fall back to the default double-buffered resident weight.
        out = build(False)(x2d, weight, b2d)

    return out[:m] if m_pad != m else out


def _pick_feature_tile(dim, target, granule=128):
    """Tile for a lane-mapped feature dim: full dim if small, else the largest
    128-aligned divisor of `dim` <= target (avoids padding the HxH weight),
    else `target` (caller pads)."""
    if dim <= target:
        return dim
    t = (target // granule) * granule
    while t >= granule:
        if dim % t == 0:
            return t
        t -= granule
    # TODO(synk): for H with no 128-aligned divisor, pad the weight once at
    # parameter-load time instead of per call.
    return target


def _linear_ktiled(x2d, weight, bias, out_dtype, cost, vmem_cap):
    m, h_in = x2d.shape
    h_out = weight.shape[0]
    sub = _sublane_multiple(x2d.dtype)

    tk = _pick_feature_tile(h_in, _KT_TK)
    tn = _pick_feature_tile(h_out, _KT_TN)
    tile_m = min(_KT_TM, _round_up(m, sub))

    m_pad = _round_up(m, tile_m)
    n_pad = _round_up(h_out, tn)
    k_pad = _round_up(h_in, tk)

    if (m_pad, k_pad) != (m, h_in):
        x2d = jnp.pad(x2d, ((0, m_pad - m), (0, k_pad - h_in)))
    if (n_pad, k_pad) != (h_out, h_in):
        # Only reached when H has no 128-aligned divisor <= the tile target.
        weight = jnp.pad(weight, ((0, n_pad - h_out), (0, k_pad - h_in)))
    if n_pad != h_out:
        bias = jnp.pad(bias, (0, n_pad - h_out))
    b2d = bias.reshape(1, n_pad)

    out = pl.pallas_call(
        _linear_ktiled_kernel,
        out_shape=jax.ShapeDtypeStruct((m_pad, n_pad), out_dtype),
        grid_spec=pltpu.PrefetchScalarGridSpec(
            num_scalar_prefetch=0,
            grid=(m_pad // tile_m, n_pad // tn, k_pad // tk),
            in_specs=[
                pl.BlockSpec((tile_m, tk), lambda i, j, k: (i, k)),
                pl.BlockSpec((tn, tk), lambda i, j, k: (j, k)),
                pl.BlockSpec((1, tn), lambda i, j, k: (0, j)),
            ],
            out_specs=pl.BlockSpec((tile_m, tn), lambda i, j, k: (i, j)),
            scratch_shapes=[pltpu.VMEM((tile_m, tn), jnp.float32)],
        ),
        compiler_params=pltpu.CompilerParams(
            dimension_semantics=("parallel", "parallel", "arbitrary"),
            vmem_limit_bytes=int(_VMEM_LIMIT_FRAC * vmem_cap)),
        cost_estimate=cost,
    )(x2d, weight, b2d)

    return out[:m, :h_out]


def efficient_forward(x, weight, bias, *, compute_dtype=None, force_ktiled=False):
    """Equivalent of nn.Linear(hidden, hidden)(x): y = x @ weight.T + bias.

    x:      [..., H_in]
    weight: [H_out, H_in]   (PyTorch layout)
    bias:   [H_out]
    compute_dtype: optionally cast x/weight (e.g. jnp.bfloat16) for the
        bf16-native MXU; accumulation stays f32 and the output is written by
        the kernel in x's original dtype. Default (None) keeps f32 so the
        nn.Linear reference numerics are preserved exactly.
    """
    orig_shape = x.shape
    h_in = orig_shape[-1]
    h_out, h_in_w = weight.shape
    assert h_in == h_in_w, "weight in_features must match x's last dim"

    out_dtype = x.dtype
    if compute_dtype is not None:
        x = x.astype(compute_dtype)
        weight = weight.astype(compute_dtype)

    x2d = x.reshape(-1, h_in)
    m = x2d.shape[0]

    cost = pl.CostEstimate(
        flops=2 * m * h_in * h_out,
        transcendentals=0,
        bytes_accessed=(m * h_in * x2d.dtype.itemsize
                        + h_out * h_in * weight.dtype.itemsize
                        + h_out * bias.dtype.itemsize
                        + m * h_out * jnp.dtype(out_dtype).itemsize),
    )

    vmem_cap = _vmem_capacity_bytes()
    weight_bytes = h_out * h_in * weight.dtype.itemsize
    use_resident = ((not force_ktiled)
                    and weight_bytes <= int(_RESIDENT_W_FRAC * vmem_cap))

    if use_resident:
        out2d = _linear_resident(x2d, weight, bias, out_dtype, cost, vmem_cap)
    else:
        out2d = _linear_ktiled(x2d, weight, bias, out_dtype, cost, vmem_cap)

    return out2d.reshape(orig_shape[:-1] + (h_out,))


if __name__ == "__main__":
    hidden = 32
    batch, seq = 2, 8

    key = jax.random.PRNGKey(0)
    kx, kw, kb = jax.random.split(key, 3)

    # Deterministic parameter init (mimics nn.Linear's uniform(-1/sqrt(H), 1/sqrt(H)))
    bound = 1.0 / (hidden ** 0.5)
    weight = jax.random.uniform(kw, (hidden, hidden), jnp.float32, -bound, bound)
    bias = jax.random.uniform(kb, (hidden,), jnp.float32, -bound, bound)
    x = jax.random.normal(kx, (batch, seq, hidden), jnp.float32)

    ref = x @ weight.T + bias

    # Resident-weight fast path (used for this H).
    out = jax.block_until_ready(efficient_forward(x, weight, bias))
    assert out.shape == ref.shape and out.dtype == ref.dtype
    assert jnp.allclose(out, ref, atol=1e-5, rtol=1e-5), "resident path mismatch"

    # K/N-tiled accumulator path (used for production-sized H).
    out_kt = jax.block_until_ready(efficient_forward(x, weight, bias, force_ktiled=True))
    assert jnp.allclose(out_kt, ref, atol=1e-5, rtol=1e-5), "k-tiled path mismatch"

    # bf16 MXU path: output is still f32 (written in-kernel from the f32 acc).
    out_bf16 = jax.block_until_ready(
        efficient_forward(x, weight, bias, compute_dtype=jnp.bfloat16))
    assert out_bf16.dtype == jnp.float32
    assert jnp.allclose(out_bf16, ref, atol=5e-2, rtol=5e-2), "bf16 path mismatch"

    print("KERNEL_OK")
</pallas_src>

<mosaic_0001>
module attributes {stable_mosaic.version = 11 : i64} {
  func.func @_linear_resident_kernel(%arg0: i32, %arg1: memref<16x32xf32, #tpu.memory_space<vmem>>, %arg2: memref<32x32xf32, #tpu.memory_space<vmem>>, %arg3: memref<1x32xf32, #tpu.memory_space<vmem>>, %arg4: memref<16x32xf32, #tpu.memory_space<vmem>>) attributes {dimension_semantics = [#tpu.dimension_semantics<parallel>], iteration_bounds = array<i64: 1>, scalar_prefetch = 0 : i64, scratch_operands = 0 : i64, tpu.core_type = #tpu.core_type<tc>, window_params = [{transform_indices = @transform_0, window_bounds = array<i64: 16, 32>}, {pipeline_mode = #tpu.pipeline_mode<synchronous>, transform_indices = @transform_1, window_bounds = array<i64: 32, 32>}, {pipeline_mode = #tpu.pipeline_mode<synchronous>, transform_indices = @transform_2, window_bounds = array<i64: 1, 32>}, {transform_indices = @transform_3, window_bounds = array<i64: 16, 32>}]} {
    %c0 = arith.constant 0 : index
    %c0_0 = arith.constant 0 : index
    %0 = vector.load %arg1[%c0, %c0_0] : memref<16x32xf32, #tpu.memory_space<vmem>>, vector<16x32xf32>
    %c0_1 = arith.constant 0 : index
    %c0_2 = arith.constant 0 : index
    %1 = vector.load %arg2[%c0_1, %c0_2] : memref<32x32xf32, #tpu.memory_space<vmem>>, vector<32x32xf32>
    %cst = arith.constant dense<0.000000e+00> : vector<16x32xf32>
    %2 = tpu.matmul %0, %1, %cst {dimension_numbers = #tpu.dot_dimension_numbers<[1], [1], [0], [0], [0, 0, 1, 0], [], []>} : vector<16x32xf32>, vector<32x32xf32>, vector<16x32xf32> -> vector<16x32xf32>
    %c0_3 = arith.constant 0 : index
    %c0_4 = arith.constant 0 : index
    %3 = vector.load %arg3[%c0_3, %c0_4] : memref<1x32xf32, #tpu.memory_space<vmem>>, vector<1x32xf32>
    %4 = vector.broadcast %3 : vector<1x32xf32> to vector<16x32xf32>
    %5 = arith.addf %2, %4 : vector<16x32xf32>
    %c0_5 = arith.constant 0 : index
    %c0_6 = arith.constant 0 : index
    %6 = vector.load %arg4[%c0_5, %c0_6] : memref<16x32xf32, #tpu.memory_space<vmem>>, vector<16x32xf32>
    tpu.vector_store %arg4[%c0_5, %c0_6], %5 {strides = array<i32>} : memref<16x32xf32, #tpu.memory_space<vmem>>, vector<16x32xf32>,
    return
  }
  func.func @transform_0(%arg0: i32) -> (i32, i32) {
    %c0_i32 = arith.constant 0 : i32
    %c0_i32_0 = arith.constant 0 : i32
    return %arg0, %c0_i32 : i32, i32
  }
  func.func @transform_1(%arg0: i32) -> (i32, i32) {
    %c0_i32 = arith.constant 0 : i32
    %c0_i32_0 = arith.constant 0 : i32
    %c0_i32_1 = arith.constant 0 : i32
    return %c0_i32, %c0_i32_0 : i32, i32
  }
  func.func @transform_2(%arg0: i32) -> (i32, i32) {
    %c0_i32 = arith.constant 0 : i32
    %c0_i32_0 = arith.constant 0 : i32
    %c0_i32_1 = arith.constant 0 : i32
    return %c0_i32, %c0_i32_0 : i32, i32
  }
  func.func @transform_3(%arg0: i32) -> (i32, i32) {
    %c0_i32 = arith.constant 0 : i32
    %c0_i32_0 = arith.constant 0 : i32
    return %arg0, %c0_i32 : i32, i32
  }
}

module attributes {stable_mosaic.version = 11 : i64} {
  func.func @_linear_resident_kernel(%arg0: i32, %arg1: memref<16x32xf32, #tpu.memory_space<vmem>>, %arg2: memref<32x32xf32, #tpu.memory_space<vmem>>, %arg3: memref<1x32xf32, #tpu.memory_space<vmem>>, %arg4: memref<16x32xf32, #tpu.memory_space<vmem>>) attributes {dimension_semantics = [#tpu.dimension_semantics<parallel>], iteration_bounds = array<i64: 1>, scalar_prefetch = 0 : i64, scratch_operands = 0 : i64, tpu.core_type = #tpu.core_type<tc>, window_params = [{transform_indices = @transform_0, window_bounds = array<i64: 16, 32>}, {pipeline_mode = #tpu.pipeline_mode<synchronous>, transform_indices = @transform_1, window_bounds = array<i64: 32, 32>}, {pipeline_mode = #tpu.pipeline_mode<synchronous>, transform_indices = @transform_2, window_bounds = array<i64: 1, 32>}, {transform_indices = @transform_3, window_bounds = array<i64: 16, 32>}]} {
    %c0 = arith.constant 0 : index
    %c0_0 = arith.constant 0 : index
    %0 = vector.load %arg1[%c0, %c0_0] : memref<16x32xf32, #tpu.memory_space<vmem>>, vector<16x32xf32>
    %c0_1 = arith.constant 0 : index
    %c0_2 = arith.constant 0 : index
    %1 = vector.load %arg2[%c0_1, %c0_2] : memref<32x32xf32, #tpu.memory_space<vmem>>, vector<32x32xf32>
    %cst = arith.constant dense<0.000000e+00> : vector<16x32xf32>
    %2 = tpu.matmul %0, %1, %cst {dimension_numbers = #tpu.dot_dimension_numbers<[1], [1], [0], [0], [0, 0, 1, 0], [], []>} : vector<16x32xf32>, vector<32x32xf32>, vector<16x32xf32> -> vector<16x32xf32>
    %c0_3 = arith.constant 0 : index
    %c0_4 = arith.constant 0 : index
    %3 = vector.load %arg3[%c0_3, %c0_4] : memref<1x32xf32, #tpu.memory_space<vmem>>, vector<1x32xf32>
    %4 = vector.broadcast %3 : vector<1x32xf32> to vector<16x32xf32>
    %5 = arith.addf %2, %4 : vector<16x32xf32>
    %c0_5 = arith.constant 0 : index
    %c0_6 = arith.constant 0 : index
    %6 = vector.load %arg4[%c0_5, %c0_6] : memref<16x32xf32, #tpu.memory_space<vmem>>, vector<16x32xf32>
    tpu.vector_store %arg4[%c0_5, %c0_6], %5 {strides = array<i32>} : memref<16x32xf32, #tpu.memory_space<vmem>>, vector<16x32xf32>,
    return
  }
  func.func @transform_0(%arg0: i32) -> (i32, i32) {
    %c0_i32 = arith.constant 0 : i32
    %c0_i32_0 = arith.constant 0 : i32
    return %arg0, %c0_i32 : i32, i32
  }
  func.func @transform_1(%arg0: i32) -> (i32, i32) {
    %c0_i32 = arith.constant 0 : i32
    %c0_i32_0 = arith.constant 0 : i32
    %c0_i32_1 = arith.constant 0 : i32
    return %c0_i32, %c0_i32_0 : i32, i32
  }
  func.func @transform_2(%arg0: i32) -> (i32, i32) {
    %c0_i32 = arith.constant 0 : i32
    %c0_i32_0 = arith.constant 0 : i32
    %c0_i32_1 = arith.constant 0 : i32
    return %c0_i32, %c0_i32_0 : i32, i32
  }
  func.func @transform_3(%arg0: i32) -> (i32, i32) {
    %c0_i32 = arith.constant 0 : i32
    %c0_i32_0 = arith.constant 0 : i32
    return %arg0, %c0_i32 : i32, i32
  }
}

</mosaic_0001>

<bundles_post_ra>
// kernel: tpu_custom_call.1
= control target key start
LH: loop header
LB: loop body
LE: loop exit
PB: predicated region body
PF: predicated region fallthrough
CT: control target
= control target key end

     0   :  { %8 = vsyncpa [#allocation3], 0  ;;  %s362_s0 = inlined_call_operand.hbm [shape: f32[16,32], index: 0, kind: input, shape index: {}]   ;;  %s363_s1 = inlined_call_operand.hbm [shape: f32[32,32], index: 1, kind: input, shape index: {}]   ;;  %s364_s2 = inlined_call_operand.vmem [shape: f32[1,32], index: 2, kind: input, shape index: {}]   ;;  %s365_s3 = inlined_call_operand.hbm [shape: f32[16,32], index: 3, kind: output, shape index: {}]  }
   0x1   :  { %9 = vsyncpa [#allocation6], 0 }
   0x2   :  { %10 = vsyncpa [#allocation4], 0  ;;  %s283_s12 = smov [#allocation2]   ;;  %s211_s16 = scalar_lea.hbm %s362_s0, 256 }
   0x3   :  { %s16_s13 = sshll.u32 %s283_s12, 4  ;;  %p212_p0 = scmp.ne.s32.totalorder %s362_s0, %s211_s16  ;;  %s17_s13 = int_to_ptr.vmem [resolvable:$true] %s16_s13 }
   0x4   :  { %p215_p1 = scmp.lt.u32.totalorder %s211_s16, %s362_s0 }
   0x6   :  { %p217_p2 = pnand %p215_p1, %p212_p0 }
   0x8   :  { %220 = shalt.err (!%p217_p2)
}
   0x9   :  { %s221_s21 = scalar_lea.vmem %s17_s13, 256  ;;  %p226_p4 = scmp.lt.s32.totalorder %s17_s13, %s17_s13 }
   0xa   :  { %p222_p3 = scmp.ne.s32.totalorder %s17_s13, %s221_s21  ;;  %p227_p5 = scmp.lt.s32.totalorder %s221_s21, %s221_s21 }
   0xc   :  { %p228_p6 = por %p227_p5, %p226_p4 }
   0xe   :  { %p229_p7 = pnand %p228_p6, %p222_p3 }
  0x10   :  { %232 = shalt.err (!%p229_p7)
}
  0x11   :  { %s284_s22 = smov 128   ;;  %s285_s23 = smov 8  }
  0x12   :  { %22 = dma.hbm_to_vmem [thread:$0]  %s362_s0, 256, %s17_s13, [#allocation3], %s284_s22, %s284_s22, %s285_s23  }
  0x13   :  { %s286_s26 = smov [#allocation5]   ;;  %s233_s30 = scalar_lea.hbm %s363_s1, 512 }
  0x14   :  { %s28_s27 = sshll.u32 %s286_s26, 4  ;;  %p234_p8 = scmp.ne.s32.totalorder %s363_s1, %s233_s30  ;;  %s29_s27 = int_to_ptr.vmem [resolvable:$true] %s28_s27 }
  0x15   :  { %p237_p9 = scmp.lt.u32.totalorder %s233_s30, %s363_s1 }
  0x17   :  { %p239_p10 = pnand %p237_p9, %p234_p8 }
  0x19   :  { %242 = shalt.err (!%p239_p10)
}
  0x1a   :  { %s243_s8 = scalar_lea.vmem %s29_s27, 512  ;;  %p248_p12 = scmp.lt.s32.totalorder %s29_s27, %s29_s27 }
  0x1b   :  { %p244_p11 = scmp.ne.s32.totalorder %s29_s27, %s243_s8  ;;  %p249_p13 = scmp.lt.s32.totalorder %s243_s8, %s243_s8 }
  0x1d   :  { %p250_p0 = por %p249_p13, %p248_p12 }
  0x1f   :  { %p251_p1 = pnand %p250_p0, %p244_p11 }
  0x21   :  { %254 = shalt.err (!%p251_p1)
}
  0x22   :  { %34 = dma.hbm_to_vmem [thread:$0]  %s363_s1, 512, %s29_s27, [#allocation6], %s284_s22, %s284_s22, %s285_s23  }
  0x23   :  { %277 = dma.done.wait [#allocation3], 256  }
  0x24   :  { %278 = vsyncadd [#allocation3], 4294967040 }
  0x25   :  { %279 = dma.done.wait [#allocation6], 512  }
  0x26   :  { %280 = vsyncadd [#allocation6], 4294966784  ;;  %vm56_vm0 = vcmask 261120   ;;  %v45_v0 = vld [vmem:[#allocation5] sm:$0xff]  ;;  %v46_v1 = vld [vmem:[#allocation5 + $0x8] sm:$0xff]  ;;  %s287_s11 = smov [#allocation7]  }
  0x27   :  { %vm195_vm1 = vmpackc.low %vm56_vm0, %vm56_vm0  ;;  %v47_v2 = vld [vmem:[#allocation5 + $0x10] sm:$0xff]  ;;  %v194_v3 = vpack.c.bf16 %v46_v1, %v45_v0  ;;  %v48_v4 = vld [vmem:[#allocation5 + $0x18] sm:$0xff]  ;;  %s157_s12 = sshll.u32 %s287_s11, 4  ;;  %s158_s12 = int_to_ptr.vmem [resolvable:$true] %s157_s12 }
  0x28   :  { %v43_v5 = vld [vmem:[#allocation2] sm:$0xff]  ;;  %v200_v6 = vpack.c.bf16 %v48_v4, %v47_v2  ;;  %v44_v7 = vld [vmem:[#allocation2 + $0x8] sm:$0xff]  ;;  %s255_s13 = scalar_lea.vmem %s158_s12, 256  ;;  %p260_p3 = scmp.lt.s32.totalorder %s158_s12, %s158_s12 }
  0x29   :  { %191 = vmatprep.mubr.msk.f32.mxu0 %vm56_vm0, %v43_v5  ;;  %196 = vmatprep.subr.msk.bf16.mxu0 %vm195_vm1, %v194_v3  ;;  %v170_v8 = vld [vmem:[%s364_s2] ss:$0 sm:$0xff]  ;;  %p256_p2 = scmp.ne.s32.totalorder %s158_s12, %s255_s13  ;;  %p261_p4 = scmp.lt.s32.totalorder %s255_s13, %s255_s13 }
  0x2a   :  { %199 = vmatpush3.bf16.xpose.msk.msra.mxu0 %vm195_vm1, %v194_v3 }
  0x2b   :  { %202 = vmatprep.subr.msk.bf16.mxu0 %vm195_vm1, %v200_v6  ;;  %p262_p5 = por %p261_p4, %p260_p3 }
  0x2d   :  { %p263_p6 = pnand %p262_p5, %p256_p2 }
  0x32   :  { %205 = vmatpush3.bf16.xpose.msk.msra.mxu0 %vm195_vm1, %v200_v6 }
  0x39   :  { %192 = vmatmul.mubr.msk.f32.vlgmr.msra.gmra.mrb[0].mxu0 %vm56_vm0, %v44_v7 }
 0x10c   :  { %v193_v9 = vpop.f32.mrb[0].mxu0 }
 0x10d   :  { %v147_v10 = vadd.f32 %v193_v9, %v170_v8  ;;  %v141_v11 = vpop.f32.mrb[1].mxu0 }
 0x10e   :  { %v142_v12 = vadd.f32 %v170_v8, %v141_v11 }
 0x10f   :  { %151 = vst.msk [vmem:[#allocation7 + $0x8] sm:$0xff] %vm56_vm0, %v147_v10 }
 0x110   :  { %150 = vst.msk [vmem:[#allocation7] sm:$0xff] %vm56_vm0, %v142_v12 }
 0x111   :  { %266 = shalt.err (!%p263_p6)
}
 0x112   :  { %s267_s15 = scalar_lea.hbm %s365_s3, 256 }
 0x113   :  { %p268_p7 = scmp.ne.s32.totalorder %s365_s3, %s267_s15  ;;  %p271_p8 = scmp.lt.u32.totalorder %s267_s15, %s365_s3 }
 0x115   :  { %p273_p9 = pnand %p271_p8, %p268_p7 }
 0x117   :  { %276 = shalt.err (!%p273_p9)
}
 0x118   :  { %163 = dma.vmem_to_hbm [thread:$0]  %s158_s12, 256, %s365_s3, [#allocation4], %s284_s22, %s284_s22, %s285_s23  }
 0x119   :  { %281 = dma.done.wait [#allocation4], 256  }
 0x11a   :  { %282 = vsyncadd [#allocation4], 4294967040 }
 0x11b   :  { %167 = vsyncpa [#allocation3], 1 }
 0x11c   :  { %168 = vsyncpa [#allocation6], 1 }
 0x11d   :  { %169 = vsyncpa [#allocation4], 1 }

// kernel: tpu_custom_call.1
= control target key start
LH: loop header
LB: loop body
LE: loop exit
PB: predicated region body
PF: predicated region fallthrough
CT: control target
= control target key end

     0   :  { %8 = vsyncpa [#allocation3], 0  ;;  %s362_s0 = inlined_call_operand.hbm [shape: f32[16,32], index: 0, kind: input, shape index: {}]   ;;  %s363_s1 = inlined_call_operand.hbm [shape: f32[32,32], index: 1, kind: input, shape index: {}]   ;;  %s364_s2 = inlined_call_operand.vmem [shape: f32[1,32], index: 2, kind: input, shape index: {}]   ;;  %s365_s3 = inlined_call_operand.hbm [shape: f32[16,32], index: 3, kind: output, shape index: {}]  }
   0x1   :  { %9 = vsyncpa [#allocation6], 0 }
   0x2   :  { %10 = vsyncpa [#allocation4], 0  ;;  %s283_s12 = smov [#allocation2]   ;;  %s211_s16 = scalar_lea.hbm %s362_s0, 256 }
   0x3   :  { %s16_s13 = sshll.u32 %s283_s12, 4  ;;  %p212_p0 = scmp.ne.s32.totalorder %s362_s0, %s211_s16  ;;  %s17_s13 = int_to_ptr.vmem [resolvable:$true] %s16_s13 }
   0x4   :  { %p215_p1 = scmp.lt.u32.totalorder %s211_s16, %s362_s0 }
   0x6   :  { %p217_p2 = pnand %p215_p1, %p212_p0 }
   0x8   :  { %220 = shalt.err (!%p217_p2)
}
   0x9   :  { %s221_s21 = scalar_lea.vmem %s17_s13, 256  ;;  %p226_p4 = scmp.lt.s32.totalorder %s17_s13, %s17_s13 }
   0xa   :  { %p222_p3 = scmp.ne.s32.totalorder %s17_s13, %s221_s21  ;;  %p227_p5 = scmp.lt.s32.totalorder %s221_s21, %s221_s21 }
   0xc   :  { %p228_p6 = por %p227_p5, %p226_p4 }
   0xe   :  { %p229_p7 = pnand %p228_p6, %p222_p3 }
  0x10   :  { %232 = shalt.err (!%p229_p7)
}
  0x11   :  { %s284_s22 = smov 128   ;;  %s285_s23 = smov 8  }
  0x12   :  { %22 = dma.hbm_to_vmem [thread:$0]  %s362_s0, 256, %s17_s13, [#allocation3], %s284_s22, %s284_s22, %s285_s23  }
  0x13   :  { %s286_s26 = smov [#allocation5]   ;;  %s233_s30 = scalar_lea.hbm %s363_s1, 512 }
  0x14   :  { %s28_s27 = sshll.u32 %s286_s26, 4  ;;  %p234_p8 = scmp.ne.s32.totalorder %s363_s1, %s233_s30  ;;  %s29_s27 = int_to_ptr.vmem [resolvable:$true] %s28_s27 }
  0x15   :  { %p237_p9 = scmp.lt.u32.totalorder %s233_s30, %s363_s1 }
  0x17   :  { %p239_p10 = pnand %p237_p9, %p234_p8 }
  0x19   :  { %242 = shalt.err (!%p239_p10)
}
  0x1a   :  { %s243_s8 = scalar_lea.vmem %s29_s27, 512  ;;  %p248_p12 = scmp.lt.s32.totalorder %s29_s27, %s29_s27 }
  0x1b   :  { %p244_p11 = scmp.ne.s32.totalorder %s29_s27, %s243_s8  ;;  %p249_p13 = scmp.lt.s32.totalorder %s243_s8, %s243_s8 }
  0x1d   :  { %p250_p0 = por %p249_p13, %p248_p12 }
  0x1f   :  { %p251_p1 = pnand %p250_p0, %p244_p11 }
  0x21   :  { %254 = shalt.err (!%p251_p1)
}
  0x22   :  { %34 = dma.hbm_to_vmem [thread:$0]  %s363_s1, 512, %s29_s27, [#allocation6], %s284_s22, %s284_s22, %s285_s23  }
  0x23   :  { %277 = dma.done.wait [#allocation3], 256  }
  0x24   :  { %278 = vsyncadd [#allocation3], 4294967040 }
  0x25   :  { %279 = dma.done.wait [#allocation6], 512  }
  0x26   :  { %280 = vsyncadd [#allocation6], 4294966784  ;;  %vm56_vm0 = vcmask 261120   ;;  %v45_v0 = vld [vmem:[#allocation5] sm:$0xff]  ;;  %v46_v1 = vld [vmem:[#allocation5 + $0x8] sm:$0xff]  ;;  %s287_s11 = smov [#allocation7]  }
  0x27   :  { %vm195_vm1 = vmpackc.low %vm56_vm0, %vm56_vm0  ;;  %v47_v2 = vld [vmem:[#allocation5 + $0x10] sm:$0xff]  ;;  %v194_v3 = vpack.c.bf16 %v46_v1, %v45_v0  ;;  %v48_v4 = vld [vmem:[#allocation5 + $0x18] sm:$0xff]  ;;  %s157_s12 = sshll.u32 %s287_s11, 4  ;;  %s158_s12 = int_to_ptr.vmem [resolvable:$true] %s157_s12 }
  0x28   :  { %v43_v5 = vld [vmem:[#allocation2] sm:$0xff]  ;;  %v200_v6 = vpack.c.bf16 %v48_v4, %v47_v2  ;;  %v44_v7 = vld [vmem:[#allocation2 + $0x8] sm:$0xff]  ;;  %s255_s13 = scalar_lea.vmem %s158_s12, 256  ;;  %p260_p3 = scmp.lt.s32.totalorder %s158_s12, %s158_s12 }
  0x29   :  { %191 = vmatprep.mubr.msk.f32.mxu0 %vm56_vm0, %v43_v5  ;;  %196 = vmatprep.subr.msk.bf16.mxu0 %vm195_vm1, %v194_v3  ;;  %v170_v8 = vld [vmem:[%s364_s2] ss:$0 sm:$0xff]  ;;  %p256_p2 = scmp.ne.s32.totalorder %s158_s12, %s255_s13  ;;  %p261_p4 = scmp.lt.s32.totalorder %s255_s13, %s255_s13 }
  0x2a   :  { %199 = vmatpush3.bf16.xpose.msk.msra.mxu0 %vm195_vm1, %v194_v3 }
  0x2b   :  { %202 = vmatprep.subr.msk.bf16.mxu0 %vm195_vm1, %v200_v6  ;;  %p262_p5 = por %p261_p4, %p260_p3 }
  0x2d   :  { %p263_p6 = pnand %p262_p5, %p256_p2 }
  0x32   :  { %205 = vmatpush3.bf16.xpose.msk.msra.mxu0 %vm195_vm1, %v200_v6 }
  0x39   :  { %192 = vmatmul.mubr.msk.f32.vlgmr.msra.gmra.mrb[0].mxu0 %vm56_vm0, %v44_v7 }
 0x10c   :  { %v193_v9 = vpop.f32.mrb[0].mxu0 }
 0x10d   :  { %v147_v10 = vadd.f32 %v193_v9, %v170_v8  ;;  %v141_v11 = vpop.f32.mrb[1].mxu0 }
 0x10e   :  { %v142_v12 = vadd.f32 %v170_v8, %v141_v11 }
 0x10f   :  { %151 = vst.msk [vmem:[#allocation7 + $0x8] sm:$0xff] %vm56_vm0, %v147_v10 }
 0x110   :  { %150 = vst.msk [vmem:[#allocation7] sm:$0xff] %vm56_vm0, %v142_v12 }
 0x111   :  { %266 = shalt.err (!%p263_p6)
}
 0x112   :  { %s267_s15 = scalar_lea.hbm %s365_s3, 256 }
 0x113   :  { %p268_p7 = scmp.ne.s32.totalorder %s365_s3, %s267_s15  ;;  %p271_p8 = scmp.lt.u32.totalorder %s267_s15, %s365_s3 }
 0x115   :  { %p273_p9 = pnand %p271_p8, %p268_p7 }
 0x117   :  { %276 = shalt.err (!%p273_p9)
}
 0x118   :  { %163 = dma.vmem_to_hbm [thread:$0]  %s158_s12, 256, %s365_s3, [#allocation4], %s284_s22, %s284_s22, %s285_s23  }
 0x119   :  { %281 = dma.done.wait [#allocation4], 256  }
 0x11a   :  { %282 = vsyncadd [#allocation4], 4294967040 }
 0x11b   :  { %167 = vsyncpa [#allocation3], 1 }
 0x11c   :  { %168 = vsyncpa [#allocation6], 1 }
 0x11d   :  { %169 = vsyncpa [#allocation4], 1 }

</bundles_post_ra>
